<compile_context>
chip_gen: v7x
topology: tpu7x:2x2x1
jax: 0.10.0
libtpu: 0.0.40
codegen_flags: <defaults>
</compile_context>

<pallas_src>
import functools

import jax
import jax.numpy as jnp
from jax.experimental import pallas as pl
from jax.experimental.pallas import tpu as pltpu


# ---------------------------------------------------------------------------
# Kernel body
# ---------------------------------------------------------------------------
def _dim_unification_kernel(x_ref, wl_ref, bl_ref, w2_ref, b2_ref, out_ref):
    """One (length-tile j, batch-tile b) grid step.  All blocks are 2-D and
    lane-dense; both matmuls are plain 2-D MXU calls.

    x_ref  : (TB*C_s, L_s)      bf16  flattened batch-tile of the input
    wl_ref : (L_s, TL)          bf16  Linear weight column tile (varies with j)
    bl_ref : (1, TL)            f32   Linear bias tile (varies with j)
    w2_ref : (TB*C_tp, TB*C_s)  f32   block-diag kron(I_TB, W_ch)  (resident)
    b2_ref : (TB*C_tp, 1)       f32   per-row (batch, out-channel) conv bias
    out_ref: (TB*C_tp, TL)
    """
    # Stage 1: length unification.  bf16 operands, f32 accumulation on the MXU.
    y = jnp.dot(x_ref[...], wl_ref[...], preferred_element_type=jnp.float32)
    y = jnp.maximum(y + bl_ref[...], 0.0)                       # (TB*C_s, TL)

    # Stage 2: 1x1 conv (channel mixing) as one matmul against the
    # block-diagonal weight -> no in-kernel reshape/transpose, dense store.
    z = jnp.dot(w2_ref[...], y, preferred_element_type=jnp.float32)
    z = jnp.maximum(z + b2_ref[...], 0.0)                       # (TB*C_tp, TL)

    out_ref[...] = z.astype(out_ref.dtype)


# ---------------------------------------------------------------------------
# Static tiling helpers (all operate on Python ints from static shapes)
# ---------------------------------------------------------------------------
def _round_up(x: int, m: int) -> int:
    return ((x + m - 1) // m) * m


def _pick_length_tile(l_tp: int, l_s: int, itemsize: int, budget_bytes: int) -> int:
    """Largest lane-multiple tile whose double-buffered W_len slab fits."""
    cands = {c for c in (512, 256, 128) if l_tp % c == 0}
    if l_tp <= 512:
        cands.add(l_tp)                       # l_tp is a multiple of 128 already
    cands = sorted(cands, reverse=True)
    for c in cands:
        if 2 * l_s * c * itemsize <= budget_bytes:
            return c
    return cands[-1]                          # smallest (128) even if over budget


def _pick_batch_tile(b: int, c_s: int, c_tp: int, l_s: int) -> int:
    """Batch tile: keep stage-1 M near the MXU height, bound the extra work of
    the block-diagonal channel weight (stage-2 flops scale with TB*C_tp), and
    respect the bf16 (16, 128) block-layout rule for the flattened x block."""
    cap = max(1, min(256 // max(c_s, 1), max(1, l_s // max(c_tp, 1)), b))

    def layout_ok(tb):
        # Block second-minor dim must be a multiple of the bf16 sublane tile
        # (16) unless the block spans the full array dim (tb == b).
        return tb == b or (tb * c_s) % 16 == 0

    best = None
    for tb in range(1, b + 1):
        if b % tb == 0 and layout_ok(tb) and tb <= cap:
            best = tb
    if best is not None:
        return best
    for tb in range(1, b + 1):                # smallest layout-valid divisor
        if b % tb == 0 and layout_ok(tb):
            return tb
    return b


# ---------------------------------------------------------------------------
# Host wrapper
# ---------------------------------------------------------------------------
@functools.partial(jax.jit, static_argnames=("compute_dtype",))
def dimension_unification_forward(x, w_len, b_len, w_ch, b_ch,
                                  compute_dtype=jnp.bfloat16):
    """x: (B, C_s, L_s); w_len: (L_t, L_s); b_len: (L_t,);
       w_ch: (C_t, C_s); b_ch: (C_t,).  Returns (B, C_t, L_t)."""
    B, C_s, L_s = x.shape
    L_t = w_len.shape[0]
    C_t = w_ch.shape[0]

    # ---- static padding / tiling decisions --------------------------------
    L_tp = _round_up(L_t, 128)                # lane-dense target length
    C_tp = _round_up(C_t, 8)                  # sublane-dense output channels
    itemsize = jnp.dtype(compute_dtype).itemsize
    tl = _pick_length_tile(L_tp, L_s, itemsize, budget_bytes=8 * 1024 * 1024)
    tb = _pick_batch_tile(B, C_s, C_tp, L_s)
    num_l = L_tp // tl
    num_b = B // tb

    # ---- host-side layout plumbing (no in-kernel transposes/reshapes) -----
    x2 = x.reshape(B * C_s, L_s).astype(compute_dtype)                 # (B*C_s, L_s)
    wl = jnp.pad(w_len, ((0, L_tp - L_t), (0, 0))).T.astype(compute_dtype)   # (L_s, L_tp)
    bl = jnp.pad(b_len, (0, L_tp - L_t)).reshape(1, L_tp).astype(jnp.float32)
    wc_p = jnp.pad(w_ch, ((0, C_tp - C_t), (0, 0))).astype(jnp.float32)      # (C_tp, C_s)
    w2 = jnp.kron(jnp.eye(tb, dtype=jnp.float32), wc_p)                # (tb*C_tp, tb*C_s)
    b2 = jnp.tile(jnp.pad(b_ch, (0, C_tp - C_t)).astype(jnp.float32),
                  tb).reshape(tb * C_tp, 1)

    # ---- VMEM budget estimate + cost estimate -----------------------------
    xb, wlb, blb = tb * C_s * L_s * itemsize, L_s * tl * itemsize, tl * 4
    outb = tb * C_tp * tl * 4
    w2b, b2b = w2.size * 4, b2.size * 4
    need = 2 * (xb + wlb + blb + outb) + 2 * (w2b + b2b)
    vmem_limit = int(min(48 * 1024 * 1024, max(32 * 1024 * 1024, 4 * need)))

    cost = pl.CostEstimate(
        flops=2 * B * C_s * L_s * L_tp + 2 * B * C_tp * tb * C_s * L_tp,
        transcendentals=0,
        bytes_accessed=(num_l * B * C_s * L_s * itemsize        # x re-streamed per length tile
                        + L_s * L_tp * itemsize + L_tp * 4      # W_len / b_len fetched once
                        + w2b + b2b                             # resident conv weight/bias
                        + B * C_tp * L_tp * 4))                 # output write

    out_flat = pl.pallas_call(
        _dim_unification_kernel,
        out_shape=jax.ShapeDtypeStruct((B * C_tp, L_tp), x.dtype),
        grid=(num_l, num_b),                  # length tile OUTER, batch tile INNER
        in_specs=[
            # x block depends only on the (inner) batch index -> unchanged while
            # the inner axis stays put; re-streamed once per length tile (cheap).
            pl.BlockSpec((tb * C_s, L_s), lambda j, b: (b, 0)),
            # W_len column tile / bias tile: depend on the OUTER index only, so
            # each tile is DMA'd from HBM exactly once for the whole grid.
            pl.BlockSpec((L_s, tl), lambda j, b: (0, j)),
            pl.BlockSpec((1, tl), lambda j, b: (0, j)),
            # Block-diagonal conv weight + bias: resident across all grid steps.
            pl.BlockSpec((tb * C_tp, tb * C_s), lambda j, b: (0, 0)),
            pl.BlockSpec((tb * C_tp, 1), lambda j, b: (0, 0)),
        ],
        out_specs=pl.BlockSpec((tb * C_tp, tl), lambda j, b: (b, j)),
        compiler_params=pltpu.CompilerParams(
            dimension_semantics=("parallel", "parallel"),
            vmem_limit_bytes=vmem_limit,
        ),
        cost_estimate=cost,
    )(x2, wl, bl, w2, b2)

    # Undo host-side flattening / padding.
    return out_flat.reshape(B, C_tp, L_tp)[:, :C_t, :L_t]


# ---------------------------------------------------------------------------
# Parameter container mirroring the PyTorch module's init
# ---------------------------------------------------------------------------
class DimensionUnificationJax:

    def __init__(self, source_channel, target_channel,
                 source_length, target_length, key):
        k1, k2, k3, k4 = jax.random.split(key, 4)
        # nn.Linear(source_length, target_length): weight (L_t, L_s), bias (L_t,)
        bound_len = 1.0 / float(source_length) ** 0.5
        self.w_len = jax.random.uniform(
            k1, (target_length, source_length), jnp.float32, -bound_len, bound_len)
        self.b_len = jax.random.uniform(
            k2, (target_length,), jnp.float32, -bound_len, bound_len)
        # nn.Conv1d(source_channel, target_channel, 1):
        #   weight (C_t, C_s, 1) -> squeezed to (C_t, C_s); bias (C_t,)
        bound_ch = 1.0 / float(source_channel) ** 0.5
        self.w_ch = jax.random.uniform(
            k3, (target_channel, source_channel), jnp.float32, -bound_ch, bound_ch)
        self.b_ch = jax.random.uniform(
            k4, (target_channel,), jnp.float32, -bound_ch, bound_ch)

    def __call__(self, source_feature):
        return dimension_unification_forward(
            source_feature, self.w_len, self.b_len, self.w_ch, self.b_ch)


# ---------------------------------------------------------------------------
# Pure-JAX references for correctness checking
# ---------------------------------------------------------------------------
def _reference_forward(x, w_len, b_len, w_ch, b_ch):
    """Exact f32 reference of the PyTorch forward."""
    y = jnp.maximum(jnp.einsum("bcs,ts->bct", x, w_len) + b_len, 0.0)
    z = jnp.maximum(jnp.einsum("oc,bct->bot", w_ch, y) + b_ch[None, :, None], 0.0)
    return z


def _reference_forward_matched(x, w_len, b_len, w_ch, b_ch, compute_dtype):
    """Reference that mirrors the kernel's bf16-operand / f32-accumulate math."""
    xc = x.astype(compute_dtype)
    wlc = w_len.astype(compute_dtype)
    y = jnp.einsum("bcs,ts->bct", xc, wlc, preferred_element_type=jnp.float32)
    y = jnp.maximum(y + b_len.astype(jnp.float32), 0.0)
    z = jnp.einsum("oc,bct->bot", w_ch.astype(jnp.float32), y,
                   preferred_element_type=jnp.float32)
    z = jnp.maximum(z + b_ch.astype(jnp.float32)[None, :, None], 0.0)
    return z


if __name__ == "__main__":
    key = jax.random.PRNGKey(0)

    configs = [
        # (batch, source_channel, target_channel, source_length, target_length)
        (2, 4, 8, 16, 128),    # clean lane-aligned shapes, single-tile grid
        (3, 4, 6, 32, 600),    # exercises C_t->8 / L_t->640 padding + multi length-tile grid
    ]

    for (B, C_S, C_T, L_S, L_T) in configs:
        key, k_mod, k_x = jax.random.split(key, 3)
        module = DimensionUnificationJax(
            source_channel=C_S, target_channel=C_T,
            source_length=L_S, target_length=L_T, key=k_mod)
        x = jax.random.normal(k_x, (B, C_S, L_S), jnp.float32)

        out = jax.block_until_ready(module(x))
        assert out.shape == (B, C_T, L_T)

        # Strict check against a reference doing the same bf16/f32 math.
        ref_matched = _reference_forward_matched(
            x, module.w_len, module.b_len, module.w_ch, module.b_ch, jnp.bfloat16)
        assert jnp.allclose(out, ref_matched, atol=1e-3, rtol=1e-3)

        # Loose sanity check against the exact f32 PyTorch-equivalent math
        # (quantization error of the bf16 operands only).
        ref_f32 = _reference_forward(
            x, module.w_len, module.b_len, module.w_ch, module.b_ch)
        rel_err = jnp.linalg.norm(out - ref_f32) / (jnp.linalg.norm(ref_f32) + 1e-12)
        assert float(rel_err) < 2e-2

    print("KERNEL_OK")
</pallas_src>

<mosaic_0001>
module attributes {stable_mosaic.version = 11 : i64} {
  func.func @_dim_unification_kernel(%arg0: i32, %arg1: i32, %arg2: memref<8x16xbf16, #tpu.memory_space<vmem>>, %arg3: memref<16x128xbf16, #tpu.memory_space<vmem>>, %arg4: memref<1x128xf32, #tpu.memory_space<vmem>>, %arg5: memref<16x8xf32, #tpu.memory_space<vmem>>, %arg6: memref<16x1xf32, #tpu.memory_space<vmem>>, %arg7: memref<16x128xf32, #tpu.memory_space<vmem>>) attributes {dimension_semantics = [#tpu.dimension_semantics<parallel>, #tpu.dimension_semantics<parallel>], iteration_bounds = array<i64: 1, 1>, scalar_prefetch = 0 : i64, scratch_operands = 0 : i64, tpu.core_type = #tpu.core_type<tc>, window_params = [{transform_indices = @transform_0, window_bounds = array<i64: 8, 16>}, {transform_indices = @transform_1, window_bounds = array<i64: 16, 128>}, {transform_indices = @transform_2, window_bounds = array<i64: 1, 128>}, {pipeline_mode = #tpu.pipeline_mode<synchronous>, transform_indices = @transform_3, window_bounds = array<i64: 16, 8>}, {pipeline_mode = #tpu.pipeline_mode<synchronous>, transform_indices = @transform_4, window_bounds = array<i64: 16, 1>}, {transform_indices = @transform_5, window_bounds = array<i64: 16, 128>}]} {
    %c0 = arith.constant 0 : index
    %c0_0 = arith.constant 0 : index
    %0 = vector.load %arg2[%c0, %c0_0] : memref<8x16xbf16, #tpu.memory_space<vmem>>, vector<8x16xbf16>
    %c0_1 = arith.constant 0 : index
    %c0_2 = arith.constant 0 : index
    %1 = vector.load %arg3[%c0_1, %c0_2] : memref<16x128xbf16, #tpu.memory_space<vmem>>, vector<16x128xbf16>
    %cst = arith.constant dense<0.000000e+00> : vector<8x128xf32>
    %2 = tpu.matmul %0, %1, %cst {dimension_numbers = #tpu.dot_dimension_numbers<[1], [0], [0], [1], [0, 0, 1, 1], [], []>} : vector<8x16xbf16>, vector<16x128xbf16>, vector<8x128xf32> -> vector<8x128xf32>
    %c0_3 = arith.constant 0 : index
    %c0_4 = arith.constant 0 : index
    %3 = vector.load %arg4[%c0_3, %c0_4] : memref<1x128xf32, #tpu.memory_space<vmem>>, vector<1x128xf32>
    %4 = vector.broadcast %3 : vector<1x128xf32> to vector<8x128xf32>
    %5 = arith.addf %2, %4 : vector<8x128xf32>
    %cst_5 = arith.constant 0.000000e+00 : f32
    %6 = vector.broadcast %cst_5 : f32 to vector<8x128xf32>
    %7 = arith.maximumf %5, %6 : vector<8x128xf32>
    %c0_6 = arith.constant 0 : index
    %c0_7 = arith.constant 0 : index
    %8 = vector.load %arg5[%c0_6, %c0_7] : memref<16x8xf32, #tpu.memory_space<vmem>>, vector<16x8xf32>
    %cst_8 = arith.constant dense<0.000000e+00> : vector<16x128xf32>
    %9 = tpu.matmul %8, %7, %cst_8 {dimension_numbers = #tpu.dot_dimension_numbers<[1], [0], [0], [1], [0, 0, 1, 1], [], []>} : vector<16x8xf32>, vector<8x128xf32>, vector<16x128xf32> -> vector<16x128xf32>
    %c0_9 = arith.constant 0 : index
    %c0_10 = arith.constant 0 : index
    %10 = vector.load %arg6[%c0_9, %c0_10] : memref<16x1xf32, #tpu.memory_space<vmem>>, vector<16x1xf32>
    %11 = vector.broadcast %10 : vector<16x1xf32> to vector<16x128xf32>
    %12 = arith.addf %9, %11 : vector<16x128xf32>
    %cst_11 = arith.constant 0.000000e+00 : f32
    %13 = vector.broadcast %cst_11 : f32 to vector<16x128xf32>
    %14 = arith.maximumf %12, %13 : vector<16x128xf32>
    %c0_12 = arith.constant 0 : index
    %c0_13 = arith.constant 0 : index
    %15 = vector.load %arg7[%c0_12, %c0_13] : memref<16x128xf32, #tpu.memory_space<vmem>>, vector<16x128xf32>
    tpu.vector_store %arg7[%c0_12, %c0_13], %14 {strides = array<i32>} : memref<16x128xf32, #tpu.memory_space<vmem>>, vector<16x128xf32>,
    return
  }
  func.func @transform_0(%arg0: i32, %arg1: i32) -> (i32, i32) {
    %c0_i32 = arith.constant 0 : i32
    %c0_i32_0 = arith.constant 0 : i32
    return %arg1, %c0_i32 : i32, i32
  }
  func.func @transform_1(%arg0: i32, %arg1: i32) -> (i32, i32) {
    %c0_i32 = arith.constant 0 : i32
    %c0_i32_0 = arith.constant 0 : i32
    return %c0_i32, %arg0 : i32, i32
  }
  func.func @transform_2(%arg0: i32, %arg1: i32) -> (i32, i32) {
    %c0_i32 = arith.constant 0 : i32
    %c0_i32_0 = arith.constant 0 : i32
    return %c0_i32, %arg0 : i32, i32
  }
  func.func @transform_3(%arg0: i32, %arg1: i32) -> (i32, i32) {
    %c0_i32 = arith.constant 0 : i32
    %c0_i32_0 = arith.constant 0 : i32
    %c0_i32_1 = arith.constant 0 : i32
    return %c0_i32, %c0_i32_0 : i32, i32
  }
  func.func @transform_4(%arg0: i32, %arg1: i32) -> (i32, i32) {
    %c0_i32 = arith.constant 0 : i32
    %c0_i32_0 = arith.constant 0 : i32
    %c0_i32_1 = arith.constant 0 : i32
    return %c0_i32, %c0_i32_0 : i32, i32
  }
  func.func @transform_5(%arg0: i32, %arg1: i32) -> (i32, i32) {
    %c0_i32 = arith.constant 0 : i32
    return %arg1, %arg0 : i32, i32
  }
}

</mosaic_0001>

<bundles_post_ra>
// kernel: tile.8
= control target key start
LH: loop header
LB: loop body
LE: loop exit
PB: predicated region body
PF: predicated region fallthrough
CT: control target
= control target key end

     0   :  { %s22_s0 = inlined_call_operand.vmem [shape: f32[8], index: 0, kind: input, shape index: {}]   ;;  %s23_s1 = inlined_call_operand.vmem [shape: f32[2,8], index: 1, kind: output, shape index: {}]  }
   0x1   :  { %v4_v0 = vld [vmem:[%s22_s0] ss:$0 sm:$0xff] }
   0x2   :  { %5 = vst [vmem:[%s23_s1] sm:$0x3] %v4_v0 }

// kernel: tile.0
= control target key start
LH: loop header
LB: loop body
LE: loop exit
PB: predicated region body
PF: predicated region fallthrough
CT: control target
= control target key end

     0   :  { %s66_s8 = smov 125   ;;  %vm7_vm0 = vcmask 7168   ;;  %s67_s11 = smov 126   ;;  %s117_s0 = inlined_call_operand.vmem [shape: f32[2,8], index: 0, kind: input, shape index: {}]   ;;  %s118_s1 = inlined_call_operand.vmem [shape: f32[16,1], index: 1, kind: output, shape index: {}]  }
   0x1   :  { %v4_v0 = vld [vmem:[%s117_s0] sm:$0x3]  ;;  %s65_s0 = smov 127   ;;  %s68_s12 = smov 124  }
   0x2   :  { %5 = vst [vmem:[#allocation0] sm:$0x3] %v4_v0  ;;  %s69_s13 = smov 123   ;;  %s70_s14 = smov 122  }
   0x3   :  { %s71_s15 = smov 121  }
   0x9   :  { %v9_v1 = vld [vmem:[#allocation0] sm:$0x3]  }
   0xa   :  { %v21_v2 = vld [vmem:[#allocation0] sm:$0x3]   ;;  %10 = vrot.lane.b32.xlu0 %v9_v1, %s65_s0 }
   0xb   :  { %22 = vrot.lane.b32.xlu1 %v21_v2, %s66_s8  ;;  %v15_v3 = vld [vmem:[#allocation0] sm:$0x3]  }
   0xc   :  { %v27_v4 = vld [vmem:[#allocation0] sm:$0x3]  }
   0xd   :  { %v6_v5 = vld [vmem:[#allocation0] sm:$0x3]  }
   0xe   :  { %8 = vst.msk [vmem:[%s118_s1] ss:$8 sm:$0x3] %vm7_vm0, %v6_v5   ;;  %16 = vrot.lane.b32.xlu0 %v15_v3, %s67_s11  ;;  %v33_v6 = vld [vmem:[#allocation0] sm:$0x3]  }
   0xf   :  { %28 = vrot.lane.b32.xlu1 %v27_v4, %s68_s12  ;;  %v39_v7 = vld [vmem:[#allocation0] sm:$0x3]  }
  0x10   :  { %v45_v8 = vld [vmem:[#allocation0] sm:$0x3]  }
  0x12   :  { %34 = vrot.lane.b32.xlu0 %v33_v6, %s69_s13 }
  0x13   :  { %40 = vrot.lane.b32.xlu1 %v39_v7, %s70_s14 }
  0x16   :  { %46 = vrot.lane.b32.xlu0 %v45_v8, %s71_s15 }
  0x7c   :  { %v11_v9 = vpop.permute.xlu0 %10  }
  0x7d   :  { %v23_v10 = vpop.permute.xlu1 %22   ;;  %51 = vst.msk [vmem:[%s118_s1 + $0x1] ss:$8 sm:$0x3] %vm7_vm0, %v11_v9  }
  0x7e   :  { %53 = vst.msk [vmem:[%s118_s1 + $0x3] ss:$8 sm:$0x3] %vm7_vm0, %v23_v10  }
  0x80   :  { %v17_v11 = vpop.permute.xlu0 %16  }
  0x81   :  { %v29_v12 = vpop.permute.xlu1 %28   ;;  %52 = vst.msk [vmem:[%s118_s1 + $0x2] ss:$8 sm:$0x3] %vm7_vm0, %v17_v11  }
  0x82   :  { %54 = vst.msk [vmem:[%s118_s1 + $0x4] ss:$8 sm:$0x3] %vm7_vm0, %v29_v12  }
  0x84   :  { %v35_v13 = vpop.permute.xlu0 %34  }
  0x85   :  { %v41_v14 = vpop.permute.xlu1 %40   ;;  %55 = vst.msk [vmem:[%s118_s1 + $0x5] ss:$8 sm:$0x3] %vm7_vm0, %v35_v13  }
  0x86   :  { %56 = vst.msk [vmem:[%s118_s1 + $0x6] ss:$8 sm:$0x3] %vm7_vm0, %v41_v14  }
  0x88   :  { %v47_v15 = vpop.permute.xlu0 %46  }
  0x89   :  { %57 = vst.msk [vmem:[%s118_s1 + $0x7] ss:$8 sm:$0x3] %vm7_vm0, %v47_v15  }

// kernel: dimension_unification_forward.1
= control target key start
LH: loop header
LB: loop body
LE: loop exit
PB: predicated region body
PF: predicated region fallthrough
CT: control target
= control target key end

     0   :  { %v252_v1 = vmov 0.0   ;;  %vm253_vm0 = vmmov 0   ;;  %vm38_vm1 = vcmask 130048   ;;  %s323_s0 = inlined_call_operand.vmem [shape: bf16[8,16], index: 0, kind: input, shape index: {}]   ;;  %s324_s1 = inlined_call_operand.vmem [shape: bf16[16,128], index: 1, kind: input, shape index: {}]   ;;  %s325_s2 = inlined_call_operand.vmem [shape: f32[1,128], index: 2, kind: input, shape index: {}]   ;;  %s326_s3 = inlined_call_operand.vmem [shape: f32[16,8], index: 3, kind: input, shape index: {}]   ;;  %s327_s4 = inlined_call_operand.vmem [shape: f32[16,1], index: 4, kind: input, shape index: {}]   ;;  %s328_s5 = inlined_call_operand.hbm [shape: f32[16,128], index: 5, kind: output, shape index: {}]  }
   0x1   :  { %v227_v0 = vld [vmem:[%s324_s1] sm:$0xff]   ;;  %209 = vmatprep.subr.bf16.mxu0 %v252_v1  ;;  %211 = vmatprep.mubr.msk.bf16.mxu0 %vm253_vm0, %v252_v1 }
   0x2   :  { %210 = vmatpush3.bf16.msra.mxu0 %v227_v0  ;;  %v22_v2 = vld [vmem:[%s323_s0] sm:$0xf] }
   0x3   :  { %10 = vsyncpa [#allocation3], 0  ;;  %v83_v3 = vld [vmem:[%s326_s3] sm:$0xff]  ;;  %vm97_vm2 = vcmask 64512   ;;  %v254_v5 = vmov 0   ;;  %v86_v6 = vld [vmem:[%s327_s4 + $0x8] sm:$0xff] }
   0x4   :  { %217 = vmatprep.mubr.msk.f32.mxu1 %vm97_vm2, %v83_v3  ;;  %v85_v4 = vld [vmem:[%s327_s4] sm:$0xff]  ;;  %226 = vset.pattern.permute.xlu0 %v254_v5  ;;  %v84_v14 = vld [vmem:[%s326_s3 + $0x8] sm:$0xff]  ;;  %s255_s4 = smov [#allocation2]  }
   0x5   :  { %212 = vmatmul.mubr.msk.bf16.vlgmr.msra.gmra.mrb[0].mxu0 %vm38_vm1, %v22_v2  ;;  %89 = vperm.xlu0 %226, %v85_v4   ;;  %v199_v7 = vld [vmem:[%s325_s2] ss:$0 sm:$0xff]  ;;  %s188_s30 = sshll.u32 %s255_s4, 4  ;;  %s189_s30 = int_to_ptr.vmem [resolvable:$true] %s188_s30 }
   0x6   :  { %s228_s2 = scalar_lea.vmem %s189_s30, 256  ;;  %p233_p1 = scmp.lt.s32.totalorder %s189_s30, %s189_s30 }
   0x7   :  { %p229_p0 = scmp.ne.s32.totalorder %s189_s30, %s228_s2  ;;  %p234_p2 = scmp.lt.s32.totalorder %s228_s2, %s228_s2 }
   0x9   :  { %94 = vperm.xlu0 %226, %v86_v6   ;;  %p235_p3 = por %p234_p2, %p233_p1 }
   0xb   :  { %p236_p4 = pnand %p235_p3, %p229_p0 }
  0x84   :  { %v90_v15 = vpop.permute.xlu0 %89 }
  0x88   :  { %v95_v16 = vpop.permute.xlu0 %94 }
  0xd8   :  { %v76_v8 = vpop.f32.mrb[0].mxu0 }
  0xd9   :  { %v77_v9 = vadd.f32 %v199_v7, %v76_v8  ;;  %v213_v10 = vpop.f32.mrb[1].mxu0 }
  0xda   :  { %v79_v11 = vpop.f32.mrb[2].mxu0 }
  0xdb   :  { %v82_v12 = vmax.f32 %v77_v9, 0.0  ;;  %v214_v13 = vpop.f32.mrb[3].mxu0 }
  0xdd   :  { %215 = vmatprep.subr.mxu1 %v82_v12 }
  0xde   :  { %216 = vmatpush3.msra.mxu1 %v82_v12 }
  0xdf   :  { %218 = vmatmul.mubr.msk.f32.vlgmr.msra.gmra.mrb[0].mxu1 %vm97_vm2, %v84_v14 }
 0x1b2   :  { %v219_v17 = vpop.f32.mrb[0].mxu1 }
 0x1b3   :  { %v176_v18 = vadd.f32 %v219_v17, %v95_v16  ;;  %v170_v19 = vpop.f32.mrb[1].mxu1 }
 0x1b4   :  { %v171_v20 = vadd.f32 %v170_v19, %v90_v15 }
 0x1b5   :  { %v180_v21 = vmax.f32 %v176_v18, 0.0 }
 0x1b6   :  { %v179_v22 = vmax.f32 %v171_v20, 0.0 }
 0x1b7   :  { %182 = vst [vmem:[#allocation2 + $0x8] sm:$0xff] %v180_v21 }
 0x1b8   :  { %181 = vst [vmem:[#allocation2] sm:$0xff] %v179_v22 }
 0x1b9   :  { %239 = shalt.err (!%p236_p4)
}
 0x1ba   :  { %s240_s7 = scalar_lea.hbm %s328_s5, 256 }
 0x1bb   :  { %p241_p5 = scmp.ne.s32.totalorder %s328_s5, %s240_s7  ;;  %p244_p6 = scmp.lt.u32.totalorder %s240_s7, %s328_s5 }
 0x1bd   :  { %p246_p7 = pnand %p244_p6, %p241_p5 }
 0x1bf   :  { %249 = shalt.err (!%p246_p7)
}
 0x1c0   :  { %s256_s12 = smov 128   ;;  %s257_s13 = smov 8  }
 0x1c1   :  { %194 = dma.vmem_to_hbm [thread:$0]  %s189_s30, 256, %s328_s5, [#allocation3], %s256_s12, %s256_s12, %s257_s13  }
 0x1c2   :  { %250 = dma.done.wait [#allocation3], 256  }
 0x1c3   :  { %251 = vsyncadd [#allocation3], 4294967040 }
 0x1c4   :  { %198 = vsyncpa [#allocation3], 1 }

</bundles_post_ra>
